<compile_context>
chip_gen: v6e
topology: v6e:2x2x1
jax: 0.10.0
libtpu: 0.0.40
codegen_flags: <defaults>
</compile_context>

<pallas_src>
import functools

import jax
import jax.numpy as jnp
from jax import lax
from jax.experimental import pallas as pl
from jax.experimental.pallas import tpu as pltpu


def _round_up(x: int, m: int) -> int:
    return (x + m - 1) // m * m


def _sublane_multiple(dtype) -> int:
    # 8 rows for 4-byte, 16 for 2-byte, 32 for 1-byte operands.
    return max(8, 32 // jnp.dtype(dtype).itemsize)


def _pick_m_tile(b: int, max_tile: int, align: int) -> int:
    """Largest tile (multiple of `align`, <= max_tile) minimizing M padding waste."""
    b_aligned = _round_up(max(b, 1), align)
    if b_aligned <= max_tile:
        return b_aligned
    best_t, best_waste = align, None
    t = align
    while t <= max_tile:
        waste = _round_up(b, t) - b
        if best_waste is None or waste < best_waste or (
            waste == best_waste and t > best_t
        ):
            best_t, best_waste = t, waste
        t += align
    return best_t


def _pick_divisor_tile(dim_padded: int, max_tile: int, align: int = 128) -> int:
    """Largest multiple of `align` dividing dim_padded, <= max_tile."""
    best = align
    t = align
    limit = min(max_tile, dim_padded)
    while t <= limit:
        if dim_padded % t == 0:
            best = t
        t += align
    return best


# --------------------------------------------------------------------------
# Kernel: one (tm, tn) output tile, reduction over the K grid axis (axis 2).
# Accumulates directly into the f32 output (resident across k).
# --------------------------------------------------------------------------
def _prompt_ff_kernel(prompt_ref, logits_ref, x_ref, w_ref, o_ref):
    k = pl.program_id(2)

    @pl.when(k == 0)
    def _():
        # In-kernel gather of the per-prompt logit rows via a one-hot matmul
        # (avoids materializing a [B, N] add-rows array in HBM).
        tm = o_ref.shape[0]
        n_prompts = logits_ref.shape[0]
        ids = prompt_ref[...]                                       # (tm, 1) int32
        iota = lax.broadcasted_iota(jnp.int32, (tm, n_prompts), 1)  # (tm, Pp)
        onehot = (ids == iota).astype(jnp.float32)
        o_ref[...] = jnp.dot(
            onehot, logits_ref[...], preferred_element_type=jnp.float32
        )

    o_ref[...] += jnp.dot(
        x_ref[...], w_ref[...], preferred_element_type=jnp.float32
    )


# --------------------------------------------------------------------------
# One-time parameter preparation (outside the per-call hot path).
# --------------------------------------------------------------------------
def prepare_params(params, *, compute_dtype=jnp.bfloat16, kn_align=128):
    """Pre-transpose/cast/pad the dense weight and precompute the per-prompt
    logit table with BOTH biases folded in:

        prompt_logits[p] = emb_table[p] @ fcp_w.T + fcp_b + fc_b

    so the forward is ONE dense GEMM plus an in-kernel row gather.
    """
    fc_w = jnp.asarray(params["fc_w"], jnp.float32)          # [N, K]
    n_out, k_in = fc_w.shape
    emb = jnp.asarray(params["emb_table"], jnp.float32)      # [P, dim_prompt]
    n_prompts = emb.shape[0]

    kp = _round_up(k_in, kn_align)
    np_ = _round_up(n_out, kn_align)
    pp = _round_up(n_prompts, 8)

    wf = fc_w.T.astype(compute_dtype)                        # [K, N] in compute dtype
    wf = jnp.pad(wf, ((0, kp - k_in), (0, np_ - n_out)))     # [Kp, Np]

    logits = (
        emb @ params["fcp_w"].T + params["fcp_b"] + params["fc_b"]
    ).astype(jnp.float32)
    logits = jnp.pad(logits, ((0, pp - n_prompts), (0, np_ - n_out)))  # [Pp, Np]

    return {
        "wf": wf,                     # padded, pre-cast weight
        "prompt_logits": logits,      # padded per-prompt output table (f32)
        "dim_output": int(n_out),     # original N (for un-padding the output)
        "dim_input": int(k_in),
    }


# --------------------------------------------------------------------------
# Jitted forward (tiles / n_out are static).
# --------------------------------------------------------------------------
@functools.partial(jax.jit, static_argnames=("n_out", "tm", "tn", "tk"))
def _prompt_ff_call(inputs, prompt, wf, prompt_logits, *, n_out, tm, tn, tk):
    b, k_in = inputs.shape
    kp, np_ = wf.shape
    pp = prompt_logits.shape[0]
    bp = _round_up(b, tm)

    x = inputs.astype(wf.dtype)
    if (bp, kp) != (b, k_in):
        x = jnp.pad(x, ((0, bp - b), (0, kp - k_in)))
    pid = jnp.asarray(prompt, jnp.int32).reshape(b, 1)
    if bp != b:
        pid = jnp.pad(pid, ((0, bp - b), (0, 0)))

    grid = (bp // tm, np_ // tn, kp // tk)

    itemsize = jnp.dtype(wf.dtype).itemsize
    cost = pl.CostEstimate(
        flops=2 * bp * kp * np_ + 2 * bp * pp * np_,
        transcendentals=0,
        bytes_accessed=(
            bp * kp * itemsize          # x
            + kp * np_ * itemsize       # w
            + pp * np_ * 4              # prompt logit table
            + bp * 4                    # prompt ids
            + bp * np_ * 4              # output
        ),
    )

    out = pl.pallas_call(
        _prompt_ff_kernel,
        out_shape=jax.ShapeDtypeStruct((bp, np_), jnp.float32),
        grid_spec=pltpu.PrefetchScalarGridSpec(
            num_scalar_prefetch=0,
            grid=grid,
            in_specs=[
                pl.BlockSpec((tm, 1), lambda i, j, k: (i, 0)),    # prompt ids
                pl.BlockSpec((pp, tn), lambda i, j, k: (0, j)),   # prompt logit slab
                pl.BlockSpec((tm, tk), lambda i, j, k: (i, k)),   # x tile
                pl.BlockSpec((tk, tn), lambda i, j, k: (k, j)),   # weight tile
            ],
            out_specs=pl.BlockSpec((tm, tn), lambda i, j, k: (i, j)),
        ),
        compiler_params=pltpu.CompilerParams(
            dimension_semantics=("parallel", "parallel", "arbitrary"),
            vmem_limit_bytes=48 << 20,   # fits v7x's 64 MiB; plenty on v5e/v6e
        ),
        cost_estimate=cost,
    )(pid, prompt_logits, x, wf)

    return out[:b, :n_out]


def prompt_ff_forward(inputs, prompt, prepared, *, tm_max=256, tn_max=512, tk_max=2048):
    """Pallas-backed forward of PromptFF.

    inputs:   [B, dim_input] float32
    prompt:   [B]            int32
    prepared: output of prepare_params()
    """
    wf = prepared["wf"]
    logits = prepared["prompt_logits"]
    n_out = prepared["dim_output"]
    b = inputs.shape[0]
    kp, np_ = wf.shape

    sub = _sublane_multiple(wf.dtype)           # 16 for bf16, 8 for f32
    tm = _pick_m_tile(b, _round_up(tm_max, sub), sub)
    tn = _pick_divisor_tile(np_, tn_max, 128)
    tk = _pick_divisor_tile(kp, tk_max, 128)

    # v7x has 2 TensorCores: keep >= 2 parallel (M,N) grid points when possible.
    bp = _round_up(b, tm)
    if (bp // tm) * (np_ // tn) < 2:
        if tn >= 256 and np_ % (tn // 2) == 0:
            tn //= 2
        elif tm >= 2 * sub and bp % (tm // 2) == 0:
            tm //= 2

    return _prompt_ff_call(inputs, prompt, wf, logits, n_out=n_out, tm=tm, tn=tn, tk=tk)


# --------------------------------------------------------------------------
# Synthetic params + pure-JAX reference (replicates the PyTorch forward).
# --------------------------------------------------------------------------
def init_params(key, dim_input, dim_prompt, dim_output, num_prompts):
    k_emb, k_fw, k_fb, k_pw, k_pb = jax.random.split(key, 5)
    bound_fc = 1.0 / jnp.sqrt(dim_input)
    bound_fp = 1.0 / jnp.sqrt(dim_prompt)
    return {
        "emb_table": jax.random.normal(k_emb, (num_prompts, dim_prompt), jnp.float32),
        "fc_w": jax.random.uniform(
            k_fw, (dim_output, dim_input), jnp.float32, -bound_fc, bound_fc
        ),
        "fc_b": jax.random.uniform(
            k_fb, (dim_output,), jnp.float32, -bound_fc, bound_fc
        ),
        "fcp_w": jax.random.uniform(
            k_pw, (dim_output, dim_prompt), jnp.float32, -bound_fp, bound_fp
        ),
        "fcp_b": jax.random.uniform(
            k_pb, (dim_output,), jnp.float32, -bound_fp, bound_fp
        ),
    }


def reference_forward(inputs, prompt, params):
    emb = jnp.take(params["emb_table"], prompt, axis=0)
    prompt_out = emb @ params["fcp_w"].T + params["fcp_b"]
    data_out = inputs @ params["fc_w"].T + params["fc_b"]
    return prompt_out + data_out


if __name__ == "__main__":
    # Small shapes consistent with the module's forward.
    batch = 8
    dim_input = 32
    dim_prompt = 16
    dim_output = 32
    num_prompts = 8
    # NOTE: at these toy sizes the call is overhead-bound; the tiling logic is
    # budgeted for MXU-scale dims (bf16 tm<=256, tn<=512, tk<=2048 ~ 8 MiB live).
    # TODO(synk): emb_cpu host placement of the embedding table is framework
    # glue (device placement), not expressible inside the kernel.

    key = jax.random.PRNGKey(0)
    k_params, k_x, k_p = jax.random.split(key, 3)

    params = init_params(k_params, dim_input, dim_prompt, dim_output, num_prompts)
    inputs = jax.random.normal(k_x, (batch, dim_input), jnp.float32)
    prompt = jax.random.randint(k_p, (batch,), 0, num_prompts, jnp.int32)

    ref = reference_forward(inputs, prompt, params)

    # f32-operand path: tight tolerance check.
    prepared_f32 = prepare_params(params, compute_dtype=jnp.float32)
    out_f32 = jax.block_until_ready(prompt_ff_forward(inputs, prompt, prepared_f32))
    assert out_f32.shape == (batch, dim_output)
    assert jnp.allclose(out_f32, ref, atol=1e-4, rtol=1e-4), "f32 mismatch vs reference"

    # bf16-operand path (default: halves HBM/VMEM operand traffic, 2x MXU rate;
    # accumulation is still f32) — looser tolerance.
    prepared_bf16 = prepare_params(params)
    out_bf16 = jax.block_until_ready(prompt_ff_forward(inputs, prompt, prepared_bf16))
    assert out_bf16.shape == (batch, dim_output)
    assert jnp.allclose(out_bf16, ref, atol=3e-2, rtol=3e-2), "bf16 mismatch vs reference"

    print("KERNEL_OK")
</pallas_src>

<mosaic_0001>
module attributes {stable_mosaic.version = 11 : i64} {
  func.func @_prompt_ff_kernel(%arg0: i32, %arg1: i32, %arg2: i32, %arg3: memref<8x1xi32, #tpu.memory_space<vmem>>, %arg4: memref<8x128xf32, #tpu.memory_space<vmem>>, %arg5: memref<8x128xf32, #tpu.memory_space<vmem>>, %arg6: memref<128x128xf32, #tpu.memory_space<vmem>>, %arg7: memref<8x128xf32, #tpu.memory_space<vmem>>) attributes {dimension_semantics = [#tpu.dimension_semantics<parallel>, #tpu.dimension_semantics<parallel>, #tpu.dimension_semantics<arbitrary>], iteration_bounds = array<i64: 1, 1, 1>, scalar_prefetch = 0 : i64, scratch_operands = 0 : i64, tpu.core_type = #tpu.core_type<tc>, window_params = [{transform_indices = @transform_0, window_bounds = array<i64: 8, 1>}, {transform_indices = @transform_1, window_bounds = array<i64: 8, 128>}, {transform_indices = @transform_2, window_bounds = array<i64: 8, 128>}, {transform_indices = @transform_3, window_bounds = array<i64: 128, 128>}, {transform_indices = @transform_4, window_bounds = array<i64: 8, 128>}]} {
    %c0_i32 = arith.constant 0 : i32
    %0 = arith.cmpi eq, %arg2, %c0_i32 : i32
    %1 = arith.extui %0 : i1 to i32
    %c0_i32_0 = arith.constant 0 : i32
    %2 = arith.cmpi ne, %1, %c0_i32_0 : i32
    scf.if %2 {
      %c0_8 = arith.constant 0 : index
      %c0_9 = arith.constant 0 : index
      %9 = vector.load %arg3[%c0_8, %c0_9] : memref<8x1xi32, #tpu.memory_space<vmem>>, vector<8x1xi32>
      %10 = tpu.iota {dimensions = array<i32: 1>} : vector<8x8xi32>
      %11 = vector.broadcast %9 : vector<8x1xi32> to vector<8x8xi32>
      %12 = arith.cmpi eq, %11, %10 : vector<8x8xi32>
      %13 = arith.extui %12 : vector<8x8xi1> to vector<8x8xi32>
      %14 = arith.sitofp %13 : vector<8x8xi32> to vector<8x8xf32>
      %c0_10 = arith.constant 0 : index
      %c0_11 = arith.constant 0 : index
      %15 = vector.load %arg4[%c0_10, %c0_11] : memref<8x128xf32, #tpu.memory_space<vmem>>, vector<8x128xf32>
      %cst_12 = arith.constant dense<0.000000e+00> : vector<8x128xf32>
      %16 = tpu.matmul %14, %15, %cst_12 {dimension_numbers = #tpu.dot_dimension_numbers<[1], [0], [0], [1], [0, 0, 1, 1], [], []>} : vector<8x8xf32>, vector<8x128xf32>, vector<8x128xf32> -> vector<8x128xf32>
      %c0_13 = arith.constant 0 : index
      %c0_14 = arith.constant 0 : index
      %17 = vector.load %arg7[%c0_13, %c0_14] : memref<8x128xf32, #tpu.memory_space<vmem>>, vector<8x128xf32>
      tpu.vector_store %arg7[%c0_13, %c0_14], %16 {strides = array<i32>} : memref<8x128xf32, #tpu.memory_space<vmem>>, vector<8x128xf32>,
    } else {
    }
    %c0 = arith.constant 0 : index
    %c0_1 = arith.constant 0 : index
    %3 = vector.load %arg7[%c0, %c0_1] : memref<8x128xf32, #tpu.memory_space<vmem>>, vector<8x128xf32>
    %c0_2 = arith.constant 0 : index
    %c0_3 = arith.constant 0 : index
    %4 = vector.load %arg5[%c0_2, %c0_3] : memref<8x128xf32, #tpu.memory_space<vmem>>, vector<8x128xf32>
    %c0_4 = arith.constant 0 : index
    %c0_5 = arith.constant 0 : index
    %5 = vector.load %arg6[%c0_4, %c0_5] : memref<128x128xf32, #tpu.memory_space<vmem>>, vector<128x128xf32>
    %cst = arith.constant dense<0.000000e+00> : vector<8x128xf32>
    %6 = tpu.matmul %4, %5, %cst {dimension_numbers = #tpu.dot_dimension_numbers<[1], [0], [0], [1], [0, 0, 1, 1], [], []>} : vector<8x128xf32>, vector<128x128xf32>, vector<8x128xf32> -> vector<8x128xf32>
    %7 = arith.addf %3, %6 : vector<8x128xf32>
    %c0_6 = arith.constant 0 : index
    %c0_7 = arith.constant 0 : index
    %8 = vector.load %arg7[%c0_6, %c0_7] : memref<8x128xf32, #tpu.memory_space<vmem>>, vector<8x128xf32>
    tpu.vector_store %arg7[%c0_6, %c0_7], %7 {strides = array<i32>} : memref<8x128xf32, #tpu.memory_space<vmem>>, vector<8x128xf32>,
    return
  }
  func.func @transform_0(%arg0: i32, %arg1: i32, %arg2: i32) -> (i32, i32) {
    %c0_i32 = arith.constant 0 : i32
    %c0_i32_0 = arith.constant 0 : i32
    return %arg0, %c0_i32 : i32, i32
  }
  func.func @transform_1(%arg0: i32, %arg1: i32, %arg2: i32) -> (i32, i32) {
    %c0_i32 = arith.constant 0 : i32
    %c0_i32_0 = arith.constant 0 : i32
    return %c0_i32, %arg1 : i32, i32
  }
  func.func @transform_2(%arg0: i32, %arg1: i32, %arg2: i32) -> (i32, i32) {
    %c0_i32 = arith.constant 0 : i32
    return %arg0, %arg2 : i32, i32
  }
  func.func @transform_3(%arg0: i32, %arg1: i32, %arg2: i32) -> (i32, i32) {
    %c0_i32 = arith.constant 0 : i32
    return %arg2, %arg1 : i32, i32
  }
  func.func @transform_4(%arg0: i32, %arg1: i32, %arg2: i32) -> (i32, i32) {
    %c0_i32 = arith.constant 0 : i32
    return %arg0, %arg1 : i32, i32
  }
}

</mosaic_0001>

<bundles_post_ra>
// kernel: _prompt_ff_call.1
= control target key start
LH: loop header
LB: loop body
LE: loop exit
PB: predicated region body
PF: predicated region fallthrough
CT: control target
= control target key end

     0   :  { %9 = vsyncpa [#allocation3], 0  ;;  %s406_s0 = inlined_call_operand.vmem [shape: s32[8,1], index: 0, kind: input, shape index: {}]   ;;  %s407_s1 = inlined_call_operand.vmem [shape: f32[8,128], index: 1, kind: input, shape index: {}]   ;;  %s408_s2 = inlined_call_operand.vmem [shape: f32[8,128], index: 2, kind: input, shape index: {}]   ;;  %s409_s3 = inlined_call_operand.hbm [shape: f32[128,128], index: 3, kind: input, shape index: {}]   ;;  %s410_s4 = inlined_call_operand.hbm [shape: f32[8,128], index: 4, kind: output, shape index: {}]  }
   0x1   :  { %10 = vsyncpa [#allocation4], 0  ;;  %s339_s15 = smov [#allocation2]  }
   0x2   :  { %s22_s16 = sshll.u32 %s339_s15, 4  ;;  %s23_s16 = int_to_ptr.vmem [resolvable:$true] %s22_s16 }
   0x3   :  { %s303_s17 = scalar_lea.vmem %s23_s16, 2048  ;;  %p308_p1 = scmp.lt.s32.totalorder %s23_s16, %s23_s16 }
   0x4   :  { %p304_p0 = scmp.ne.s32.totalorder %s23_s16, %s303_s17  ;;  %p309_p2 = scmp.lt.s32.totalorder %s303_s17, %s303_s17 }
   0x6   :  { %p310_p3 = por %p309_p2, %p308_p1 }
   0x8   :  { %p311_p4 = pnand %p310_p3, %p304_p0 }
   0xa   :  { %314 = shalt.err (!%p311_p4)
}
   0xb   :  { %s340_s18 = smov 128   ;;  %s341_s19 = smov 8  }
   0xc   :  { %28 = dma.hbm_to_vmem [thread:$0]  %s409_s3, 2048, %s23_s16, [#allocation3], %s340_s18, %s340_s18, %s341_s19  }
   0xd   :  { %335 = dma.done.wait [#allocation3], 2048  }
   0xe   :  { %336 = vsyncadd [#allocation3], 4294965248  ;;  %v342_v0 = vmov 0   ;;  %v343_v1 = vmov 0.0   ;;  %vm344_vm0 = vmmov 0   ;;  %v36_v2 = vld [vmem:[%s406_s0] sm:$0xff]  ;;  %v37_v21 = vlaneseq }
   0xf   :  { %294 = vset.pattern.permute.xlu0 %v342_v0  ;;  %252 = vmatprep.subr.mxu1 %v343_v1  ;;  %v138_v3 = vld [vmem:[#allocation2 + $0x78] sm:$0xff]  ;;  %v137_v4 = vld [vmem:[#allocation2 + $0x70] sm:$0xff]  ;;  %v136_v5 = vld [vmem:[#allocation2 + $0x68] sm:$0xff]  ;;  %vm46_vm1 = vcmask 64512   ;;  %s345_s25 = smov [#allocation5]  }
  0x10   :  { %247 = vmatprep.subr.mxu0 %v343_v1  ;;  %249 = vmatprep.mubr.msk.f32.mxu0 %vm344_vm0, %v343_v1  ;;  %v135_v6 = vld [vmem:[#allocation2 + $0x60] sm:$0xff]  ;;  %v134_v8 = vld [vmem:[#allocation2 + $0x58] sm:$0xff]  ;;  %v133_v9 = vld [vmem:[#allocation2 + $0x50] sm:$0xff]  ;;  %v38_v22 = vand.u32 127, %v37_v21  ;;  %s217_s26 = sshll.u32 %s345_s25, 4  ;;  %s218_s26 = int_to_ptr.vmem [resolvable:$true] %s217_s26 }
  0x11   :  { %284 = vmatprep.mubr.msk.f32.mxu1 %vm344_vm0, %v343_v1  ;;  %40 = vperm.xlu0 %294, %v36_v2   ;;  %v45_v7 = vld [vmem:[%s407_s1] sm:$0xff]  ;;  %v132_v10 = vld [vmem:[#allocation2 + $0x48] sm:$0xff]  ;;  %v130_v12 = vld [vmem:[#allocation2 + $0x38] sm:$0xff]  ;;  %p320_p6 = scmp.lt.s32.totalorder %s218_s26, %s218_s26 }
  0x12   :  { %253 = vmatpush3.msra.mxu1 %v138_v3  ;;  %248 = vmatpush3.msra.mxu0 %v45_v7  ;;  %v131_v11 = vld [vmem:[#allocation2 + $0x40] sm:$0xff]  ;;  %v129_v13 = vld [vmem:[#allocation2 + $0x30] sm:$0xff]  ;;  %v128_v14 = vld [vmem:[#allocation2 + $0x28] sm:$0xff] }
  0x13   :  { %254 = vmatprep.subr.mxu1 %v343_v1  ;;  %v127_v15 = vld [vmem:[#allocation2 + $0x20] sm:$0xff]  ;;  %v126_v16 = vld [vmem:[#allocation2 + $0x18] sm:$0xff]  ;;  %v125_v17 = vld [vmem:[#allocation2 + $0x10] sm:$0xff] }
  0x14   :  { %255 = vmatpush3.msra.mxu1 %v137_v4  ;;  %v124_v18 = vld [vmem:[#allocation2 + $0x8] sm:$0xff]  ;;  %v123_v19 = vld [vmem:[#allocation2] sm:$0xff] }
  0x15   :  { %256 = vmatprep.subr.mxu1 %v343_v1  ;;  %v122_v20 = vld [vmem:[%s408_s2] sm:$0xff]  ;;  %s315_s2 = scalar_lea.vmem %s218_s26, 128 }
  0x16   :  { %257 = vmatpush3.msra.mxu1 %v136_v5  ;;  %p316_p5 = scmp.ne.s32.totalorder %s218_s26, %s315_s2  ;;  %p321_p7 = scmp.lt.s32.totalorder %s315_s2, %s315_s2 }
  0x17   :  { %258 = vmatprep.subr.mxu1 %v343_v1 }
  0x18   :  { %259 = vmatpush3.msra.mxu1 %v135_v6  ;;  %p322_p8 = por %p321_p7, %p320_p6 }
  0x19   :  { %260 = vmatprep.subr.mxu1 %v343_v1 }
  0x1a   :  { %261 = vmatpush3.msra.mxu1 %v134_v8  ;;  %p323_p9 = pnand %p322_p8, %p316_p5 }
  0x1b   :  { %262 = vmatprep.subr.mxu1 %v343_v1 }
  0x1c   :  { %263 = vmatpush3.msra.mxu1 %v133_v9 }
  0x1d   :  { %264 = vmatprep.subr.mxu1 %v343_v1 }
  0x1e   :  { %265 = vmatpush3.msra.mxu1 %v132_v10 }
  0x1f   :  { %266 = vmatprep.subr.mxu1 %v343_v1 }
  0x20   :  { %267 = vmatpush3.msra.mxu1 %v131_v11 }
  0x21   :  { %268 = vmatprep.subr.mxu1 %v343_v1 }
  0x22   :  { %269 = vmatpush3.msra.mxu1 %v130_v12 }
  0x23   :  { %270 = vmatprep.subr.mxu1 %v343_v1 }
  0x24   :  { %271 = vmatpush3.msra.mxu1 %v129_v13 }
  0x25   :  { %272 = vmatprep.subr.mxu1 %v343_v1 }
  0x26   :  { %273 = vmatpush3.msra.mxu1 %v128_v14 }
  0x27   :  { %274 = vmatprep.subr.mxu1 %v343_v1 }
  0x28   :  { %275 = vmatpush3.msra.mxu1 %v127_v15 }
  0x29   :  { %276 = vmatprep.subr.mxu1 %v343_v1 }
  0x2a   :  { %277 = vmatpush3.msra.mxu1 %v126_v16 }
  0x2b   :  { %278 = vmatprep.subr.mxu1 %v343_v1 }
  0x2c   :  { %279 = vmatpush3.msra.mxu1 %v125_v17 }
  0x2d   :  { %280 = vmatprep.subr.mxu1 %v343_v1 }
  0x2e   :  { %281 = vmatpush3.msra.mxu1 %v124_v18 }
  0x2f   :  { %282 = vmatprep.subr.mxu1 %v343_v1 }
  0x30   :  { %283 = vmatpush3.msra.mxu1 %v123_v19 }
  0x31   :  { %285 = vmatmul.mubr.f32.vlgmr.msra.gmra.mxu1 %v122_v20 }
  0x8c   :  { %v41_v23 = vpop.permute.xlu0 %40 }
  0x8d   :  { %vm42_vm2 = vcmp.eq.s32.totalorder %v41_v23, %v38_v22 }
  0x8e   :  { %v226_v24 = vsel %vm42_vm2, 1.0, %v343_v1 }
  0x8f   :  { %250 = vmatmul.mubr.msk.f32.vlgmr.msra.gmra.mxu0 %vm46_vm1, %v226_v24 }
  0xf1   :  { %v205_v25 = vpop.f32.mrf.mxu1 }
  0xf3   :  { %v286_v26 = vpop.f32.mrf.mxu1 }
 0x14f   :  { %v116_v27 = vpop.f32.mrf.mxu0 }
 0x150   :  { %v209_v28 = vadd.f32 %v205_v25, %v116_v27 }
 0x151   :  { %v251_v29 = vpop.f32.mrf.mxu0 }
 0x152   :  { %210 = vst [vmem:[#allocation5] sm:$0xff] %v209_v28 }
 0x153   :  { %326 = shalt.err (!%p323_p9)
}
 0x154   :  { %220 = dma.vmem_to_hbm [thread:$0]  %s218_s26, 128, %s410_s4, [#allocation4]  }
 0x155   :  { %337 = dma.done.wait [#allocation4], 128  }
 0x156   :  { %338 = vsyncadd [#allocation4], 4294967168 }
 0x157   :  { %224 = vsyncpa [#allocation3], 1 }
 0x158   :  { %225 = vsyncpa [#allocation4], 1 }

</bundles_post_ra>
